<compile_context>
chip_gen: v5e
topology: v5e:2x2
jax: 0.10.0
libtpu: 0.0.40
codegen_flags: <defaults>
</compile_context>

<pallas_src>
import functools
import math

import jax
import jax.numpy as jnp
from jax.experimental import pallas as pl
from jax.experimental.pallas import tpu as pltpu


def _round_up(a, m):
    return (a + m - 1) // m * m


def _halve_tile(t):
    """Halve a row tile, keeping it a positive multiple of 8."""
    return max(8, ((t // 2) + 7) // 8 * 8)


def _vmem_budget_bytes():
    """Generation-aware scoped-VMEM budget (~75% of physical per-core VMEM)."""
    cap = None
    try:
        info = pltpu.get_tpu_info()
        for name in ("vmem_capacity_bytes", "vmem_bytes", "vmem_size_bytes"):
            cap = getattr(info, name, None)
            if cap:
                break
    except Exception:
        cap = None
    if not cap:
        cap = 64 * 2**20  # conservative fallback = v7x per-TensorCore VMEM
    return int(cap) * 3 // 4


# -----------------------------------------------------------------------------
# Path 1: weight-resident kernel.  Weights are fetched once (constant index_map)
# and stay in VMEM; the hidden dim is swept in-kernel so weight HBM traffic is
# paid once per call instead of once per row tile.
# -----------------------------------------------------------------------------
def _ff_resident_kernel(x_ref, w1v_ref, w1g_ref, b1v_ref, b1g_ref,
                        w2_ref, b2_ref, o_ref, acc_ref, *, th, n_chunks):
    # x_ref: (tm, dim_p)   w1v/w1g: (dim_p, H_p)   b1v/b1g: (1, H_p)
    # w2:    (H_p, dim_p)  b2: (1, dim_p)          o/acc: (tm, dim_p)
    # Fold b2 into the accumulator init (no zero-fill + no epilogue add).
    acc_ref[...] = jnp.broadcast_to(b2_ref[...].astype(jnp.float32),
                                    acc_ref.shape)

    def body(c, carry):
        off = pl.multiple_of(c * th, th)
        x = x_ref[...]  # native dtype straight to the MXU
        val = jnp.dot(x, w1v_ref[:, pl.ds(off, th)],
                      preferred_element_type=jnp.float32)
        val = val + b1v_ref[:, pl.ds(off, th)].astype(jnp.float32)
        gates = jnp.dot(x, w1g_ref[:, pl.ds(off, th)],
                        preferred_element_type=jnp.float32)
        gates = gates + b1g_ref[:, pl.ds(off, th)].astype(jnp.float32)
        # GEGLU: val * gelu(gates), exact-erf GELU (torch F.gelu default).
        gelu = 0.5 * gates * (1.0 + jax.lax.erf(gates * (1.0 / math.sqrt(2.0))))
        inter = (val * gelu).astype(w2_ref.dtype)
        # Dropout(p=0.0) is the identity.
        acc_ref[...] += jnp.dot(inter, w2_ref[pl.ds(off, th), :],
                                preferred_element_type=jnp.float32)
        return carry

    jax.lax.fori_loop(0, n_chunks, body, 0, unroll=n_chunks <= 8)
    o_ref[...] = acc_ref[...].astype(o_ref.dtype)


# -----------------------------------------------------------------------------
# Path 2: streaming kernel (weights too large for VMEM residency).  2-D grid
# with the hidden-chunk reduction axis last; per-row-tile accumulator in VMEM.
# -----------------------------------------------------------------------------
def _ff_stream_kernel(x_ref, w1v_ref, w1g_ref, b1v_ref, b1g_ref,
                      w2_ref, b2_ref, o_ref, acc_ref):
    c = pl.program_id(1)

    @pl.when(c == 0)
    def _():
        acc_ref[...] = jnp.broadcast_to(b2_ref[...].astype(jnp.float32),
                                        acc_ref.shape)

    x = x_ref[...]
    val = jnp.dot(x, w1v_ref[...], preferred_element_type=jnp.float32)
    val = val + b1v_ref[...].astype(jnp.float32)
    gates = jnp.dot(x, w1g_ref[...], preferred_element_type=jnp.float32)
    gates = gates + b1g_ref[...].astype(jnp.float32)
    gelu = 0.5 * gates * (1.0 + jax.lax.erf(gates * (1.0 / math.sqrt(2.0))))
    inter = (val * gelu).astype(w2_ref.dtype)
    # Dropout(p=0.0) is the identity.
    acc_ref[...] += jnp.dot(inter, w2_ref[...],
                            preferred_element_type=jnp.float32)

    @pl.when(c == pl.num_programs(1) - 1)
    def _():
        o_ref[...] = acc_ref[...].astype(o_ref.dtype)


def feedforward(x, w1, b1, w2, b2, *, tm=None, th=None, weight_dtype=None):
    """x: (B, N, dim) -> (B, N, dim). Fused Linear -> GEGLU -> Linear."""
    B, N, dim = x.shape
    two_h = w1.shape[1]
    H = w2.shape[0]
    assert two_h == 2 * H
    M = B * N
    out_dtype = x.dtype

    if weight_dtype is not None:
        # Opt-in (recommended bf16 on v5e with f32 params): halves weight HBM
        # traffic and restores full MXU rate; accumulation stays f32.
        w1 = w1.astype(weight_dtype); b1 = b1.astype(weight_dtype)
        w2 = w2.astype(weight_dtype); b2 = b2.astype(weight_dtype)
        x = x.astype(weight_dtype)

    # Split W1 / b1 into value & gate halves in the wrapper (no lane-slicing of
    # a (tm, 2H) slab inside the kernel).
    w1v, w1g = w1[:, :H], w1[:, H:]
    b1v, b1g = b1[:H], b1[H:]

    dim_p = _round_up(dim, 128)

    # Hidden chunk width: never 128 (half-efficiency contraction on the
    # 256-wide MXUs of v6e/v7x); H is padded so th in {512, 256} divides it.
    if th is None:
        H_p = _round_up(H, 256)
        th = 512 if H_p % 512 == 0 else 256
    else:
        th = max(128, _round_up(th, 128))
        H_p = _round_up(H, th)

    if tm is None:
        tm = 512 if dim_p <= 2048 else 256
    tm_eff = min(tm, _round_up(M, 16))

    # Give both v7x TensorCores a row tile when there is enough work.
    while (_round_up(M, tm_eff) // tm_eff < 2 and tm_eff >= 32
           and (tm_eff // 2) % 8 == 0):
        tm_eff //= 2

    xb = jnp.dtype(x.dtype).itemsize
    wb = jnp.dtype(w1v.dtype).itemsize
    ob = jnp.dtype(out_dtype).itemsize

    def _common_bytes(tm_, th_):
        return (2 * tm_ * dim_p * xb          # x tile (double-buffered)
                + 2 * tm_ * dim_p * ob        # out tile
                + tm_ * dim_p * 4             # f32 accumulator scratch
                + 4 * tm_ * th_ * 4           # val / gates / gelu / inter (f32)
                + tm_ * th_ * wb)             # inter cast fed to 2nd matmul

    def _resident_bytes(tm_, th_):
        # Weights counted double-buffered (conservative) even though the
        # constant index_map means they are only DMA'd once.
        return (_common_bytes(tm_, th_)
                + 2 * 3 * dim_p * H_p * wb    # W1v + W1g + W2 resident
                + 2 * (2 * H_p + dim_p) * wb)  # biases

    def _stream_bytes(tm_, th_):
        return (_common_bytes(tm_, th_)
                + 2 * 3 * dim_p * th_ * wb    # W1v / W1g / W2 chunks
                + 2 * (2 * th_ + dim_p) * wb)  # bias chunks + b2

    cap = _vmem_budget_bytes()

    use_resident = _resident_bytes(tm_eff, th) <= cap
    if not use_resident:
        tm_try = tm_eff
        while _resident_bytes(tm_try, th) > cap and tm_try > 128:
            tm_try = _halve_tile(tm_try)
        if _resident_bytes(tm_try, th) <= cap:
            use_resident = True
            tm_eff = min(tm_eff, tm_try)
    if not use_resident:
        # Streaming fallback: shrink th then tm until the working set fits.
        while _stream_bytes(tm_eff, th) > cap:
            if th > 256:
                th //= 2
                H_p = _round_up(H, th)
            elif tm_eff > 64:
                tm_eff = _halve_tile(tm_eff)
            else:
                break

    M_p = _round_up(M, tm_eff)
    n_chunks = H_p // th

    # Zero padding contributes zero to the result and is sliced off at the end.
    x2 = jnp.pad(x.reshape(M, dim), ((0, M_p - M), (0, dim_p - dim)))
    w1v_p = jnp.pad(w1v, ((0, dim_p - dim), (0, H_p - H)))
    w1g_p = jnp.pad(w1g, ((0, dim_p - dim), (0, H_p - H)))
    b1v_p = jnp.pad(b1v, (0, H_p - H)).reshape(1, H_p)
    b1g_p = jnp.pad(b1g, (0, H_p - H)).reshape(1, H_p)
    w2_p = jnp.pad(w2, ((0, H_p - H), (0, dim_p - dim)))
    b2_p = jnp.pad(b2, (0, dim_p - dim)).reshape(1, dim_p)

    if use_resident:
        grid = (M_p // tm_eff,)
        kernel = functools.partial(_ff_resident_kernel, th=th,
                                   n_chunks=n_chunks)
        in_specs = [
            pl.BlockSpec((tm_eff, dim_p), lambda i: (i, 0)),   # x rows
            pl.BlockSpec((dim_p, H_p), lambda i: (0, 0)),      # W1 value half
            pl.BlockSpec((dim_p, H_p), lambda i: (0, 0)),      # W1 gate half
            pl.BlockSpec((1, H_p), lambda i: (0, 0)),          # b1 value half
            pl.BlockSpec((1, H_p), lambda i: (0, 0)),          # b1 gate half
            pl.BlockSpec((H_p, dim_p), lambda i: (0, 0)),      # W2
            pl.BlockSpec((1, dim_p), lambda i: (0, 0)),        # b2
        ]
        out_specs = pl.BlockSpec((tm_eff, dim_p), lambda i: (i, 0))
        semantics = ("parallel",)
    else:
        grid = (M_p // tm_eff, n_chunks)
        kernel = _ff_stream_kernel
        in_specs = [
            pl.BlockSpec((tm_eff, dim_p), lambda i, c: (i, 0)),  # x rows
            pl.BlockSpec((dim_p, th), lambda i, c: (0, c)),      # W1 value chunk
            pl.BlockSpec((dim_p, th), lambda i, c: (0, c)),      # W1 gate chunk
            pl.BlockSpec((1, th), lambda i, c: (0, c)),          # b1 value chunk
            pl.BlockSpec((1, th), lambda i, c: (0, c)),          # b1 gate chunk
            pl.BlockSpec((th, dim_p), lambda i, c: (c, 0)),      # W2 chunk
            pl.BlockSpec((1, dim_p), lambda i, c: (0, 0)),       # b2
        ]
        out_specs = pl.BlockSpec((tm_eff, dim_p), lambda i, c: (i, 0))
        semantics = ("parallel", "arbitrary")

    out2 = pl.pallas_call(
        kernel,
        out_shape=jax.ShapeDtypeStruct((M_p, dim_p), out_dtype),
        grid_spec=pltpu.PrefetchScalarGridSpec(
            num_scalar_prefetch=0,
            grid=grid,
            in_specs=in_specs,
            out_specs=out_specs,
            scratch_shapes=[pltpu.VMEM((tm_eff, dim_p), jnp.float32)],
        ),
        compiler_params=pltpu.CompilerParams(
            dimension_semantics=semantics,
            vmem_limit_bytes=cap),
    )(x2, w1v_p, w1g_p, b1v_p, b1g_p, w2_p, b2_p)

    return out2[:M, :dim].reshape(B, N, dim)


def _init_linear(key, fan_in, fan_out, dtype=jnp.float32):
    # Deterministic stand-in for PyTorch's default Linear init (uniform in
    # +/- 1/sqrt(fan_in)); weights stored as (fan_in, fan_out) for x @ W.
    kw, kb = jax.random.split(key)
    bound = 1.0 / math.sqrt(fan_in)
    w = jax.random.uniform(kw, (fan_in, fan_out), dtype, -bound, bound)
    b = jax.random.uniform(kb, (fan_out,), dtype, -bound, bound)
    return w, b


if __name__ == "__main__":
    B, N, dim, mult = 2, 8, 32, 4
    H = dim * mult  # 128

    key = jax.random.PRNGKey(0)
    kx, k1, k2 = jax.random.split(key, 3)

    x = jax.random.normal(kx, (B, N, dim), jnp.float32)
    w1, b1 = _init_linear(k1, dim, 2 * H)   # Linear(dim, dim*mult*2)
    w2, b2 = _init_linear(k2, H, dim)       # Linear(dim*mult, dim)

    out = feedforward(x, w1, b1, w2, b2)
    out = jax.block_until_ready(out)

    # Pure-JAX reference (same math as the PyTorch module).
    h_ref = x.reshape(-1, dim) @ w1 + b1
    val, gates = h_ref[:, :H], h_ref[:, H:]
    inter = val * (0.5 * gates * (1.0 + jax.lax.erf(gates / math.sqrt(2.0))))
    ref = (inter @ w2 + b2).reshape(B, N, dim)
    assert jnp.allclose(out, ref, atol=1e-4, rtol=1e-4), float(
        jnp.max(jnp.abs(out - ref)))

    print("KERNEL_OK")
</pallas_src>

<mosaic_0001>
module attributes {stable_mosaic.version = 11 : i64} {
  func.func @_ff_resident_kernel(%arg0: i32, %arg1: memref<16x128xf32, #tpu.memory_space<vmem>>, %arg2: memref<128x256xf32, #tpu.memory_space<vmem>>, %arg3: memref<128x256xf32, #tpu.memory_space<vmem>>, %arg4: memref<1x256xf32, #tpu.memory_space<vmem>>, %arg5: memref<1x256xf32, #tpu.memory_space<vmem>>, %arg6: memref<256x128xf32, #tpu.memory_space<vmem>>, %arg7: memref<1x128xf32, #tpu.memory_space<vmem>>, %arg8: memref<16x128xf32, #tpu.memory_space<vmem>>, %arg9: memref<16x128xf32, #tpu.memory_space<vmem>>) attributes {dimension_semantics = [#tpu.dimension_semantics<parallel>], iteration_bounds = array<i64: 1>, scalar_prefetch = 0 : i64, scratch_operands = 1 : i64, tpu.core_type = #tpu.core_type<tc>, window_params = [{transform_indices = @transform_0, window_bounds = array<i64: 16, 128>}, {pipeline_mode = #tpu.pipeline_mode<synchronous>, transform_indices = @transform_1, window_bounds = array<i64: 128, 256>}, {pipeline_mode = #tpu.pipeline_mode<synchronous>, transform_indices = @transform_2, window_bounds = array<i64: 128, 256>}, {pipeline_mode = #tpu.pipeline_mode<synchronous>, transform_indices = @transform_3, window_bounds = array<i64: 1, 256>}, {pipeline_mode = #tpu.pipeline_mode<synchronous>, transform_indices = @transform_4, window_bounds = array<i64: 1, 256>}, {pipeline_mode = #tpu.pipeline_mode<synchronous>, transform_indices = @transform_5, window_bounds = array<i64: 256, 128>}, {pipeline_mode = #tpu.pipeline_mode<synchronous>, transform_indices = @transform_6, window_bounds = array<i64: 1, 128>}, {transform_indices = @transform_7, window_bounds = array<i64: 16, 128>}]} {
    %c0 = arith.constant 0 : index
    %c0_0 = arith.constant 0 : index
    %0 = vector.load %arg7[%c0, %c0_0] : memref<1x128xf32, #tpu.memory_space<vmem>>, vector<1x128xf32>
    %1 = vector.shape_cast %0 : vector<1x128xf32> to vector<1x128xf32>
    %2 = vector.broadcast %1 : vector<1x128xf32> to vector<16x128xf32>
    %c0_1 = arith.constant 0 : index
    %c0_2 = arith.constant 0 : index
    %3 = vector.load %arg9[%c0_1, %c0_2] : memref<16x128xf32, #tpu.memory_space<vmem>>, vector<16x128xf32>
    tpu.vector_store %arg9[%c0_1, %c0_2], %2 {strides = array<i32>} : memref<16x128xf32, #tpu.memory_space<vmem>>, vector<16x128xf32>,
    %c0_i32 = arith.constant 0 : i32
    %c256_i32 = arith.constant 256 : i32
    %4 = arith.muli %c0_i32, %c256_i32 : i32
    %5 = tpu.assume_multiple %4, 256 : i32
    %c0_3 = arith.constant 0 : index
    %c0_4 = arith.constant 0 : index
    %6 = vector.load %arg1[%c0_3, %c0_4] : memref<16x128xf32, #tpu.memory_space<vmem>>, vector<16x128xf32>
    %c0_5 = arith.constant 0 : index
    %7 = arith.index_cast %5 : i32 to index
    %8 = vector.load %arg2[%c0_5, %7] : memref<128x256xf32, #tpu.memory_space<vmem>>, vector<128x256xf32>
    %cst = arith.constant dense<0.000000e+00> : vector<16x256xf32>
    %9 = tpu.matmul %6, %8, %cst {dimension_numbers = #tpu.dot_dimension_numbers<[1], [0], [0], [1], [0, 0, 1, 1], [], []>} : vector<16x128xf32>, vector<128x256xf32>, vector<16x256xf32> -> vector<16x256xf32>
    %c0_6 = arith.constant 0 : index
    %10 = arith.index_cast %5 : i32 to index
    %11 = vector.load %arg4[%c0_6, %10] : memref<1x256xf32, #tpu.memory_space<vmem>>, vector<1x256xf32>
    %12 = vector.broadcast %11 : vector<1x256xf32> to vector<16x256xf32>
    %13 = arith.addf %9, %12 : vector<16x256xf32>
    %c0_7 = arith.constant 0 : index
    %14 = arith.index_cast %5 : i32 to index
    %15 = vector.load %arg3[%c0_7, %14] : memref<128x256xf32, #tpu.memory_space<vmem>>, vector<128x256xf32>
    %cst_8 = arith.constant dense<0.000000e+00> : vector<16x256xf32>
    %16 = tpu.matmul %6, %15, %cst_8 {dimension_numbers = #tpu.dot_dimension_numbers<[1], [0], [0], [1], [0, 0, 1, 1], [], []>} : vector<16x128xf32>, vector<128x256xf32>, vector<16x256xf32> -> vector<16x256xf32>
    %c0_9 = arith.constant 0 : index
    %17 = arith.index_cast %5 : i32 to index
    %18 = vector.load %arg5[%c0_9, %17] : memref<1x256xf32, #tpu.memory_space<vmem>>, vector<1x256xf32>
    %19 = vector.broadcast %18 : vector<1x256xf32> to vector<16x256xf32>
    %20 = arith.addf %16, %19 : vector<16x256xf32>
    %cst_10 = arith.constant 5.000000e-01 : f32
    %21 = vector.broadcast %cst_10 : f32 to vector<16x256xf32>
    %22 = arith.mulf %21, %20 : vector<16x256xf32>
    %cst_11 = arith.constant 0.707106769 : f32
    %23 = vector.broadcast %cst_11 : f32 to vector<16x256xf32>
    %24 = arith.mulf %20, %23 : vector<16x256xf32>
    %25 = math.erf %24 : vector<16x256xf32>
    %cst_12 = arith.constant 1.000000e+00 : f32
    %26 = vector.broadcast %cst_12 : f32 to vector<16x256xf32>
    %27 = arith.addf %26, %25 : vector<16x256xf32>
    %28 = arith.mulf %22, %27 : vector<16x256xf32>
    %29 = arith.mulf %13, %28 : vector<16x256xf32>
    %c0_13 = arith.constant 0 : index
    %c0_14 = arith.constant 0 : index
    %30 = vector.load %arg9[%c0_13, %c0_14] : memref<16x128xf32, #tpu.memory_space<vmem>>, vector<16x128xf32>
    %31 = arith.index_cast %5 : i32 to index
    %c0_15 = arith.constant 0 : index
    %32 = vector.load %arg6[%31, %c0_15] : memref<256x128xf32, #tpu.memory_space<vmem>>, vector<256x128xf32>
    %cst_16 = arith.constant dense<0.000000e+00> : vector<16x128xf32>
    %33 = tpu.matmul %29, %32, %cst_16 {dimension_numbers = #tpu.dot_dimension_numbers<[1], [0], [0], [1], [0, 0, 1, 1], [], []>} : vector<16x256xf32>, vector<256x128xf32>, vector<16x128xf32> -> vector<16x128xf32>
    %34 = arith.addf %30, %33 : vector<16x128xf32>
    %c0_17 = arith.constant 0 : index
    %c0_18 = arith.constant 0 : index
    %35 = vector.load %arg9[%c0_17, %c0_18] : memref<16x128xf32, #tpu.memory_space<vmem>>, vector<16x128xf32>
    tpu.vector_store %arg9[%c0_17, %c0_18], %34 {strides = array<i32>} : memref<16x128xf32, #tpu.memory_space<vmem>>, vector<16x128xf32>,
    %c1_i32 = arith.constant 1 : i32
    %c0_19 = arith.constant 0 : index
    %c0_20 = arith.constant 0 : index
    %36 = vector.load %arg9[%c0_19, %c0_20] : memref<16x128xf32, #tpu.memory_space<vmem>>, vector<16x128xf32>
    %c0_21 = arith.constant 0 : index
    %c0_22 = arith.constant 0 : index
    %37 = vector.load %arg8[%c0_21, %c0_22] : memref<16x128xf32, #tpu.memory_space<vmem>>, vector<16x128xf32>
    tpu.vector_store %arg8[%c0_21, %c0_22], %36 {strides = array<i32>} : memref<16x128xf32, #tpu.memory_space<vmem>>, vector<16x128xf32>,
    return
  }
  func.func @transform_0(%arg0: i32) -> (i32, i32) {
    %c0_i32 = arith.constant 0 : i32
    %c0_i32_0 = arith.constant 0 : i32
    return %arg0, %c0_i32 : i32, i32
  }
  func.func @transform_1(%arg0: i32) -> (i32, i32) {
    %c0_i32 = arith.constant 0 : i32
    %c0_i32_0 = arith.constant 0 : i32
    %c0_i32_1 = arith.constant 0 : i32
    return %c0_i32, %c0_i32_0 : i32, i32
  }
  func.func @transform_2(%arg0: i32) -> (i32, i32) {
    %c0_i32 = arith.constant 0 : i32
    %c0_i32_0 = arith.constant 0 : i32
    %c0_i32_1 = arith.constant 0 : i32
    return %c0_i32, %c0_i32_0 : i32, i32
  }
  func.func @transform_3(%arg0: i32) -> (i32, i32) {
    %c0_i32 = arith.constant 0 : i32
    %c0_i32_0 = arith.constant 0 : i32
    %c0_i32_1 = arith.constant 0 : i32
    return %c0_i32, %c0_i32_0 : i32, i32
  }
  func.func @transform_4(%arg0: i32) -> (i32, i32) {
    %c0_i32 = arith.constant 0 : i32
    %c0_i32_0 = arith.constant 0 : i32
    %c0_i32_1 = arith.constant 0 : i32
    return %c0_i32, %c0_i32_0 : i32, i32
  }
  func.func @transform_5(%arg0: i32) -> (i32, i32) {
    %c0_i32 = arith.constant 0 : i32
    %c0_i32_0 = arith.constant 0 : i32
    %c0_i32_1 = arith.constant 0 : i32
    return %c0_i32, %c0_i32_0 : i32, i32
  }
  func.func @transform_6(%arg0: i32) -> (i32, i32) {
    %c0_i32 = arith.constant 0 : i32
    %c0_i32_0 = arith.constant 0 : i32
    %c0_i32_1 = arith.constant 0 : i32
    return %c0_i32, %c0_i32_0 : i32, i32
  }
  func.func @transform_7(%arg0: i32) -> (i32, i32) {
    %c0_i32 = arith.constant 0 : i32
    %c0_i32_0 = arith.constant 0 : i32
    return %arg0, %c0_i32 : i32, i32
  }
}

</mosaic_0001>

<bundles_post_ra>
// kernel: tpu_custom_call.1
= control target key start
LH: loop header
LB: loop body
LE: loop exit
PB: predicated region body
PF: predicated region fallthrough
CT: control target
= control target key end

     0   :  { %12 = vsyncpa [#allocation4], 0  ;;  %s975_s0 = inlined_call_operand.hbm [shape: f32[16,128], index: 0, kind: input, shape index: {}]   ;;  %s976_s1 = inlined_call_operand.hbm [shape: f32[128,256], index: 1, kind: input, shape index: {}]   ;;  %s977_s2 = inlined_call_operand.hbm [shape: f32[128,256], index: 2, kind: input, shape index: {}]   ;;  %s978_s3 = inlined_call_operand.vmem [shape: f32[1,256], index: 3, kind: input, shape index: {}]   ;;  %s979_s4 = inlined_call_operand.hbm [shape: f32[1,256], index: 4, kind: input, shape index: {}]   ;;  %s980_s5 = inlined_call_operand.hbm [shape: f32[256,128], index: 5, kind: input, shape index: {}]   ;;  %s981_s6 = inlined_call_operand.vmem [shape: f32[1,128], index: 6, kind: input, shape index: {}]   ;;  %s982_s7 = inlined_call_operand.hbm [shape: f32[16,128], index: 7, kind: output, shape index: {}]  }
   0x1   :  { %13 = vsyncpa [#allocation7], 0 }
   0x2   :  { %14 = vsyncpa [#allocation10], 0  ;;  %s33_s26 = sshll.u32 %s976_s1, 4  ;;  %s34_s26 = int_to_ptr.hbm [resolvable:$true] %s33_s26 }
   0x3   :  { %15 = vsyncpa [#allocation5], 0  ;;  %s775_s27 = smov [#allocation6]   ;;  %s62_s8 = sshll.u32 %s979_s4, 4  ;;  %s63_s8 = int_to_ptr.hbm [resolvable:$true] %s62_s8 }
   0x4   :  { %s35_s28 = sshll.u32 %s775_s27, 4  ;;  %s776_s9 = smov 256   ;;  %s36_s28 = int_to_ptr.vmem [resolvable:$true] %s35_s28 }
   0x5   :  { %s777_s10 = smov 16   ;;  %s778_s11 = smov [#allocation9]  }
   0x6   :  { %41 = dma.hbm_to_vmem [thread:$0]  %s34_s26, 4096, %s36_s28, [#allocation7], %s776_s9, %s776_s9, %s777_s10  }
   0x7   :  { %s64_s12 = sshll.u32 %s778_s11, 4  ;;  %s20_s15 = sshll.u32 %s975_s0, 4  ;;  %s65_s12 = int_to_ptr.vmem [resolvable:$true] %s64_s12  ;;  %s21_s15 = int_to_ptr.hbm [resolvable:$true] %s20_s15 }
   0x8   :  { %67 = dma.hbm_to_vmem [thread:$0]  %s63_s8, 32, %s65_s12, [#allocation10]  }
   0x9   :  { %s779_s1 = smov [#allocation3]   ;;  %s46_s4 = sshll.u32 %s977_s2, 4  ;;  %s47_s4 = int_to_ptr.hbm [resolvable:$true] %s46_s4 }
   0xa   :  { %s22_s16 = sshll.u32 %s779_s1, 4  ;;  %s780_s19 = smov 128   ;;  %s23_s16 = int_to_ptr.vmem [resolvable:$true] %s22_s16 }
   0xb   :  { %s781_s20 = smov 8   ;;  %s782_s21 = smov [#allocation8]  }
   0xc   :  { %28 = dma.hbm_to_vmem [thread:$0]  %s21_s15, 256, %s23_s16, [#allocation4], %s780_s19, %s780_s19, %s781_s20  }
   0xd   :  { %s48_s22 = sshll.u32 %s782_s21, 4  ;;  %s72_s24 = sshll.u32 %s980_s5, 4  ;;  %s49_s22 = int_to_ptr.vmem [resolvable:$true] %s48_s22  ;;  %s73_s24 = int_to_ptr.hbm [resolvable:$true] %s72_s24 }
   0xe   :  { %54 = dma.hbm_to_vmem [thread:$0]  %s47_s4, 4096, %s49_s22, [#allocation7], %s776_s9, %s776_s9, %s777_s10  }
   0xf   :  { %s783_s25 = smov [#allocation11]  }
  0x10   :  { %s74_s26 = sshll.u32 %s783_s25, 4  ;;  %s75_s26 = int_to_ptr.vmem [resolvable:$true] %s74_s26 }
  0x11   :  { %80 = dma.hbm_to_vmem [thread:$0]  %s73_s24, 4096, %s75_s26, [#allocation10], %s780_s19, %s780_s19, %s781_s20  }
  0x12   :  { %767 = dma.done.wait [#allocation4], 256  }
  0x13   :  { %768 = vsyncadd [#allocation4], 4294967040 }
  0x14   :  { %769 = dma.done.wait [#allocation7], 8192  }
  0x15   :  { %770 = vsyncadd [#allocation7], 4294959104 }
  0x16   :  { %771 = dma.done.wait [#allocation10], 4128  }
  0x17   :  { %772 = vsyncadd [#allocation10], 4294963168  ;;  %v225_v0 = vld [vmem:[#allocation8 + $0xf0] sm:$0xff]  ;;  %v226_v1 = vld [vmem:[#allocation8 + $0xf8] sm:$0xff]  ;;  %s784_s28 = smov [#allocation12]   ;;  %s553_s9 = sshll.u32 %s982_s7, 4  ;;  %s554_s9 = int_to_ptr.hbm [resolvable:$true] %s553_s9 }
  0x18   :  { %v223_v2 = vld [vmem:[#allocation8 + $0xe0] sm:$0xff]  ;;  %233 = vmatpush.msra.mxu2 %v225_v0  ;;  %256 = vmatpush.msra.mxu3 %v226_v1  ;;  %v224_v3 = vld [vmem:[#allocation8 + $0xe8] sm:$0xff]  ;;  %v221_v4 = vld [vmem:[#allocation8 + $0xd0] sm:$0xff]  ;;  %s551_s29 = sshll.u32 %s784_s28, 4  ;;  %s552_s29 = int_to_ptr.vmem [resolvable:$true] %s551_s29 }
  0x19   :  { %v222_v5 = vld [vmem:[#allocation8 + $0xd8] sm:$0xff]  ;;  %v219_v6 = vld [vmem:[#allocation8 + $0xc0] sm:$0xff]  ;;  %v220_v7 = vld [vmem:[#allocation8 + $0xc8] sm:$0xff] }
  0x1a   :  { %234 = vmatpush.msra.mxu2 %v223_v2  ;;  %257 = vmatpush.msra.mxu3 %v224_v3  ;;  %v217_v8 = vld [vmem:[#allocation8 + $0xb0] sm:$0xff]  ;;  %v218_v9 = vld [vmem:[#allocation8 + $0xb8] sm:$0xff]  ;;  %v215_v10 = vld [vmem:[#allocation8 + $0xa0] sm:$0xff] }
  0x1b   :  { %v216_v11 = vld [vmem:[#allocation8 + $0xa8] sm:$0xff]  ;;  %v213_v12 = vld [vmem:[#allocation8 + $0x90] sm:$0xff]  ;;  %v214_v13 = vld [vmem:[#allocation8 + $0x98] sm:$0xff] }
  0x1c   :  { %235 = vmatpush.msra.mxu2 %v221_v4  ;;  %258 = vmatpush.msra.mxu3 %v222_v5  ;;  %v211_v14 = vld [vmem:[#allocation8 + $0x80] sm:$0xff]  ;;  %v141_v15 = vld [vmem:[#allocation6 + $0xf0] sm:$0xff]  ;;  %v142_v16 = vld [vmem:[#allocation6 + $0xf8] sm:$0xff] }
  0x1d   :  { %v212_v17 = vld [vmem:[#allocation8 + $0x88] sm:$0xff]  ;;  %149 = vmatpush.msra.mxu0 %v141_v15  ;;  %172 = vmatpush.msra.mxu1 %v142_v16  ;;  %v139_v18 = vld [vmem:[#allocation6 + $0xe0] sm:$0xff]  ;;  %v137_v20 = vld [vmem:[#allocation6 + $0xd0] sm:$0xff] }
  0x1e   :  { %236 = vmatpush.msra.mxu2 %v219_v6  ;;  %259 = vmatpush.msra.mxu3 %v220_v7  ;;  %v140_v19 = vld [vmem:[#allocation6 + $0xe8] sm:$0xff]  ;;  %v138_v21 = vld [vmem:[#allocation6 + $0xd8] sm:$0xff]  ;;  %v209_v22 = vld [vmem:[#allocation8 + $0x70] sm:$0xff] }
  0x1f   :  { %v210_v23 = vld [vmem:[#allocation8 + $0x78] sm:$0xff]  ;;  %150 = vmatpush.msra.mxu0 %v139_v18  ;;  %173 = vmatpush.msra.mxu1 %v140_v19  ;;  %v135_v24 = vld [vmem:[#allocation6 + $0xc0] sm:$0xff]  ;;  %v136_v25 = vld [vmem:[#allocation6 + $0xc8] sm:$0xff] }
  0x20   :  { %237 = vmatpush.msra.mxu2 %v217_v8  ;;  %260 = vmatpush.msra.mxu3 %v218_v9  ;;  %v207_v26 = vld [vmem:[#allocation8 + $0x60] sm:$0xff]  ;;  %v208_v27 = vld [vmem:[#allocation8 + $0x68] sm:$0xff]  ;;  %v133_v28 = vld [vmem:[#allocation6 + $0xb0] sm:$0xff] }
  0x21   :  { %151 = vmatpush.msra.mxu0 %v137_v20  ;;  %174 = vmatpush.msra.mxu1 %v138_v21  ;;  %v134_v29 = vld [vmem:[#allocation6 + $0xb8] sm:$0xff]  ;;  %v205_v30 = vld [vmem:[#allocation8 + $0x50] sm:$0xff]  ;;  %v131_v32 = vld [vmem:[#allocation6 + $0xa0] sm:$0xff] }
  0x22   :  { %238 = vmatpush.msra.mxu2 %v215_v10  ;;  %261 = vmatpush.msra.mxu3 %v216_v11  ;;  %v206_v31 = vld [vmem:[#allocation8 + $0x58] sm:$0xff]  ;;  %v132_v33 = vld [vmem:[#allocation6 + $0xa8] sm:$0xff]  ;;  %v203_v34 = vld [vmem:[#allocation8 + $0x40] sm:$0xff] }
  0x23   :  { %152 = vmatpush.msra.mxu0 %v135_v24  ;;  %175 = vmatpush.msra.mxu1 %v136_v25  ;;  %v204_v35 = vld [vmem:[#allocation8 + $0x48] sm:$0xff]  ;;  %v129_v36 = vld [vmem:[#allocation6 + $0x90] sm:$0xff]  ;;  %v130_v37 = vld [vmem:[#allocation6 + $0x98] sm:$0xff] }
  0x24   :  { %239 = vmatpush.msra.mxu2 %v213_v12  ;;  %262 = vmatpush.msra.mxu3 %v214_v13  ;;  %v201_v38 = vld [vmem:[#allocation8 + $0x30] sm:$0xff]  ;;  %v202_v39 = vld [vmem:[#allocation8 + $0x38] sm:$0xff]  ;;  %v127_v40 = vld [vmem:[#allocation6 + $0x80] sm:$0xff] }
  0x25   :  { %153 = vmatpush.msra.mxu0 %v133_v28  ;;  %176 = vmatpush.msra.mxu1 %v134_v29  ;;  %v128_v41 = vld [vmem:[#allocation6 + $0x88] sm:$0xff]  ;;  %v199_v42 = vld [vmem:[#allocation8 + $0x20] sm:$0xff]  ;;  %v125_v44 = vld [vmem:[#allocation6 + $0x70] sm:$0xff] }
  0x26   :  { %240 = vmatpush.msra.mxu2 %v211_v14  ;;  %263 = vmatpush.msra.mxu3 %v212_v17  ;;  %v200_v43 = vld [vmem:[#allocation8 + $0x28] sm:$0xff]  ;;  %v126_v45 = vld [vmem:[#allocation6 + $0x78] sm:$0xff]  ;;  %v197_v46 = vld [vmem:[#allocation8 + $0x10] sm:$0xff] }
  0x27   :  { %154 = vmatpush.msra.mxu0 %v131_v32  ;;  %177 = vmatpush.msra.mxu1 %v132_v33  ;;  %v198_v47 = vld [vmem:[#allocation8 + $0x18] sm:$0xff]  ;;  %v123_v48 = vld [vmem:[#allocation6 + $0x60] sm:$0xff]  ;;  %v124_v49 = vld [vmem:[#allocation6 + $0x68] sm:$0xff] }
  0x28   :  { %241 = vmatpush.msra.mxu2 %v209_v22  ;;  %264 = vmatpush.msra.mxu3 %v210_v23  ;;  %v195_v50 = vld [vmem:[#allocation8] sm:$0xff]  ;;  %v196_v51 = vld [vmem:[#allocation8 + $0x8] sm:$0xff]  ;;  %v109_v52 = vld [vmem:[#allocation3] sm:$0xff] }
  0x29   :  { %155 = vmatpush.msra.mxu0 %v129_v36  ;;  %178 = vmatpush.msra.mxu1 %v130_v37  ;;  %v121_v53 = vld [vmem:[#allocation6 + $0x50] sm:$0xff]  ;;  %v122_v54 = vld [vmem:[#allocation6 + $0x58] sm:$0xff]  ;;  %v119_v55 = vld [vmem:[#allocation6 + $0x40] sm:$0xff] }
  0x2a   :  { %242 = vmatpush.msra.mxu2 %v207_v26  ;;  %265 = vmatpush.msra.mxu3 %v208_v27  ;;  %v120_v56 = vld [vmem:[#allocation6 + $0x48] sm:$0xff]  ;;  %v117_v57 = vld [vmem:[#allocation6 + $0x30] sm:$0xff]  ;;  %v118_v58 = vld [vmem:[#allocation6 + $0x38] sm:$0xff] }
  0x2b   :  { %156 = vmatpush.msra.mxu0 %v127_v40  ;;  %179 = vmatpush.msra.mxu1 %v128_v41  ;;  %v115_v59 = vld [vmem:[#allocation6 + $0x20] sm:$0xff]  ;;  %v116_v60 = vld [vmem:[#allocation6 + $0x28] sm:$0xff]  ;;  %v110_v61 = vld [vmem:[#allocation3 + $0x8] sm:$0xff] }
  0x2c   :  { %243 = vmatpush.msra.mxu2 %v205_v30  ;;  %266 = vmatpush.msra.mxu3 %v206_v31  ;;  %v113_v62 = vld [vmem:[#allocation6 + $0x10] sm:$0xff]  ;;  %v114_v63 = vld [vmem:[#allocation6 + $0x18] sm:$0xff]  ;;  %v111_v0 = vld [vmem:[#allocation6] sm:$0xff] }
  0x2d   :  { %157 = vmatpush.msra.mxu0 %v125_v44  ;;  %180 = vmatpush.msra.mxu1 %v126_v45  ;;  %v112_v1 = vld [vmem:[#allocation6 + $0x8] sm:$0xff]  ;;  %v227_v2 = vld [vmem:[#allocation9] sm:$0x3]  ;;  %v475_v15 = vld [vmem:[#allocation11 + $0x70] sm:$0xff] }
  0x2e   :  { %244 = vmatpush.msra.mxu2 %v203_v34  ;;  %267 = vmatpush.msra.mxu3 %v204_v35  ;;  %v229_v3 = vperm.slane %v227_v2, 0  ;;  %v230_v4 = vperm.slane %v227_v2, 1  ;;  %v476_v11 = vld [vmem:[#allocation11 + $0x78] sm:$0xff]  ;;  %v491_v16 = vld [vmem:[#allocation11 + $0xf0] sm:$0xff]  ;;  %v474_v19 = vld [vmem:[#allocation11 + $0x68] sm:$0xff] }
  0x2f   :  { %158 = vmatpush.msra.mxu0 %v123_v48  ;;  %181 = vmatpush.msra.mxu1 %v124_v49  ;;  %v492_v12 = vld [vmem:[#allocation11 + $0xf8] sm:$0xff]  ;;  %v490_v20 = vld [vmem:[#allocation11 + $0xe8] sm:$0xff]  ;;  %v473_v29 = vld [vmem:[#allocation11 + $0x60] sm:$0xff] }
  0x30   :  { %245 = vmatpush.msra.mxu2 %v201_v38  ;;  %268 = vmatpush.msra.mxu3 %v202_v39  ;;  %v489_v30 = vld [vmem:[#allocation11 + $0xe0] sm:$0xff]  ;;  %v472_v40 = vld [vmem:[#allocation11 + $0x58] sm:$0xff]  ;;  %v487_v45 = vld [vmem:[#allocation11 + $0xd0] sm:$0xff] }
  0x31   :  { %159 = vmatpush.msra.mxu0 %v121_v53  ;;  %182 = vmatpush.msra.mxu1 %v122_v54  ;;  %v488_v41 = vld [vmem:[#allocation11 + $0xd8] sm:$0xff]  ;;  %v486_v53 = vld [vmem:[#allocation11 + $0xc8] sm:$0xff] }
  0x32   :  { %246 = vmatpush.msra.mxu2 %v199_v42  ;;  %269 = vmatpush.msra.mxu3 %v200_v43  ;;  %v471_v42 = vld [vmem:[#allocation11 + $0x50] sm:$0xff] }
  0x33   :  { %160 = vmatpush.msra.mxu0 %v119_v55  ;;  %183 = vmatpush.msra.mxu1 %v120_v56 }
  0x34   :  { %247 = vmatpush.msra.mxu2 %v197_v46  ;;  %270 = vmatpush.msra.mxu3 %v198_v47 }
  0x35   :  { %161 = vmatpush.msra.mxu0 %v117_v57  ;;  %184 = vmatpush.msra.mxu1 %v118_v58  ;;  %v469_v58 = vld [vmem:[#allocation11 + $0x40] sm:$0xff] }
  0x36   :  { %248 = vmatpush.msra.mxu2 %v195_v50  ;;  %271 = vmatpush.msra.mxu3 %v196_v51 }
  0x37   :  { %249 = vmatmul.f32.vlgmr.msra.gmra.mxu2 %v109_v52  ;;  %272 = vmatmul.f32.vlgmr.msra.gmra.mxu3 %v109_v52 }
  0x38   :  { %162 = vmatpush.msra.mxu0 %v115_v59  ;;  %185 = vmatpush.msra.mxu1 %v116_v60  ;;  %v485_v59 = vld [vmem:[#allocation11 + $0xc0] sm:$0xff] }
  0x39   :  { %572 = vmatpush.msrb.mxu2 %v476_v11  ;;  %588 = vmatpush.msrb.mxu3 %v492_v12 }
  0x3a   :  { %163 = vmatpush.msra.mxu0 %v113_v62  ;;  %186 = vmatpush.msra.mxu1 %v114_v63 }
  0x3b   :  { %573 = vmatpush.msrb.mxu2 %v475_v15  ;;  %589 = vmatpush.msrb.mxu3 %v491_v16 }
  0x3c   :  { %164 = vmatpush.msra.mxu0 %v111_v0  ;;  %187 = vmatpush.msra.mxu1 %v112_v1 }
  0x3d   :  { %165 = vmatmul.f32.vlgmr.msra.gmra.mxu0 %v109_v52  ;;  %188 = vmatmul.f32.vlgmr.msra.gmra.mxu1 %v109_v52  ;;  %v470_v52 = vld [vmem:[#allocation11 + $0x48] sm:$0xff] }
  0x3e   :  { %493 = vmatpush.msrb.mxu0 %v476_v11  ;;  %516 = vmatpush.msrb.mxu1 %v492_v12  ;;  %v468_v12 = vld [vmem:[#allocation11 + $0x38] sm:$0xff] }
  0x3f   :  { %252 = vmatmul.f32.gmra.mxu2 %v110_v61  ;;  %275 = vmatmul.f32.gmra.mxu3 %v110_v61 }
  0x40   :  { %494 = vmatpush.msrb.mxu0 %v475_v15  ;;  %517 = vmatpush.msrb.mxu1 %v491_v16 }
  0x41   :  { %574 = vmatpush.msrb.mxu2 %v474_v19  ;;  %590 = vmatpush.msrb.mxu3 %v490_v20 }
  0x42   :  { %495 = vmatpush.msrb.mxu0 %v474_v19  ;;  %518 = vmatpush.msrb.mxu1 %v490_v20 }
  0x43   :  { %575 = vmatpush.msrb.mxu2 %v473_v29  ;;  %591 = vmatpush.msrb.mxu3 %v489_v30 }
  0x44   :  { %496 = vmatpush.msrb.mxu0 %v473_v29  ;;  %519 = vmatpush.msrb.mxu1 %v489_v30 }
  0x45   :  { %168 = vmatmul.f32.gmra.mxu0 %v110_v61  ;;  %191 = vmatmul.f32.gmra.mxu1 %v110_v61 }
  0x46   :  { %497 = vmatpush.msrb.mxu0 %v472_v40  ;;  %520 = vmatpush.msrb.mxu1 %v488_v41 }
  0x47   :  { %576 = vmatpush.msrb.mxu2 %v472_v40  ;;  %592 = vmatpush.msrb.mxu3 %v488_v41  ;;  %v481_v40 = vld [vmem:[#allocation11 + $0xa0] sm:$0xff] }
  0x48   :  { %498 = vmatpush.msrb.mxu0 %v471_v42  ;;  %521 = vmatpush.msrb.mxu1 %v487_v45 }
  0x49   :  { %577 = vmatpush.msrb.mxu2 %v471_v42  ;;  %593 = vmatpush.msrb.mxu3 %v487_v45  ;;  %v464_v42 = vld [vmem:[#allocation11 + $0x18] sm:$0xff] }
  0x4a   :  { %499 = vmatpush.msrb.mxu0 %v470_v52  ;;  %522 = vmatpush.msrb.mxu1 %v486_v53 }
  0x4b   :  { %578 = vmatpush.msrb.mxu2 %v470_v52  ;;  %594 = vmatpush.msrb.mxu3 %v486_v53  ;;  %v479_v52 = vld [vmem:[#allocation11 + $0x90] sm:$0xff] }
  0x4c   :  { %500 = vmatpush.msrb.mxu0 %v469_v58  ;;  %523 = vmatpush.msrb.mxu1 %v485_v59 }
  0x4d   :  { %579 = vmatpush.msrb.mxu2 %v469_v58  ;;  %595 = vmatpush.msrb.mxu3 %v485_v59 }
  0x4e   :  { %501 = vmatpush.msrb.mxu0 %v468_v12 }
  0x4f   :  { %580 = vmatpush.msrb.mxu2 %v468_v12 }
  0xba   :  { %v250_v5 = vpop.f32.mrf.mxu2  ;;  %v273_v6 = vpop.f32.mrf.mxu3 }
  0xbb   :  { %v846_v7 = vadd.f32 %v250_v5, %v229_v3  ;;  %v848_v8 = vadd.f32 %v273_v6, %v230_v4 }
  0xbd   :  { %v851_v9 = vmul.f32 0.70710677, %v846_v7  ;;  %v854_v10 = vmul.f32 0.70710677, %v848_v8 }
  0xbf   :  { %v287_v13 = vmul.f32 %v851_v9, %v851_v9  ;;  %v327_v14 = vmul.f32 %v854_v10, %v854_v10 }
  0xc1   :  { %v860_v17 = vmin.f32 %v287_v13, 16.0  ;;  %v862_v18 = vmin.f32 %v327_v14, 16.0  ;;  %v484_v13 = vld [vmem:[#allocation11 + $0xb8] sm:$0xff]  ;;  %v467_v14 = vld [vmem:[#allocation11 + $0x30] sm:$0xff] }
  0xc2   :  { %v253_v21 = vpop.f32.mrf.mxu2  ;;  %v276_v22 = vpop.f32.mrf.mxu3  ;;  %524 = vmatpush.msrb.mxu1 %v484_v13  ;;  %596 = vmatpush.msrb.mxu3 %v484_v13 }
  0xc3   :  { %v289_v23 = vmul.f32 2.1237322e-06, %v860_v17  ;;  %v300_v24 = vmul.f32 3.8918573e-05, %v860_v17  ;;  %v329_v25 = vmul.f32 2.1237322e-06, %v862_v18  ;;  %v867_v26 = vadd.f32 %v253_v21, %v229_v3  ;;  %502 = vmatpush.msrb.mxu0 %v467_v14  ;;  %581 = vmatpush.msrb.mxu2 %v467_v14 }
  0xc4   :  { %v340_v27 = vmul.f32 3.8918573e-05, %v862_v18  ;;  %v870_v28 = vadd.f32 %v276_v22, %v230_v4  ;;  %v483_v21 = vld [vmem:[#allocation11 + $0xb0] sm:$0xff] }
  0xc5   :  { %v290_v31 = vadd.f32 0.00028619796, %v289_v23  ;;  %v301_v32 = vadd.f32 0.001143296, %v300_v24  ;;  %v330_v33 = vadd.f32 0.00028619796, %v329_v25  ;;  %525 = vmatpush.msrb.mxu1 %v483_v21  ;;  %597 = vmatpush.msrb.mxu3 %v483_v21 }
  0xc6   :  { %v341_v34 = vadd.f32 0.001143296, %v340_v27  ;;  %v873_v35 = vmul.f32 0.70710677, %v867_v26  ;;  %v879_v39 = vmul.f32 0.70710677, %v870_v28 }
  0xc7   :  { %v291_v36 = vmul.f32 %v290_v31, %v860_v17  ;;  %v302_v37 = vmul.f32 %v301_v32, %v860_v17  ;;  %v331_v38 = vmul.f32 %v330_v33, %v862_v18  ;;  %v466_v31 = vld [vmem:[#allocation11 + $0x28] sm:$0xff]  ;;  %v465_v33 = vld [vmem:[#allocation11 + $0x20] sm:$0xff] }
  0xc8   :  { %v342_v43 = vmul.f32 %v341_v34, %v862_v18  ;;  %v367_v44 = vmul.f32 %v873_v35, %v873_v35  ;;  %v407_v49 = vmul.f32 %v879_v39, %v879_v39  ;;  %v482_v32 = vld [vmem:[#allocation11 + $0xa8] sm:$0xff]  ;;  %503 = vmatpush.msrb.mxu0 %v466_v31  ;;  %582 = vmatpush.msrb.mxu2 %v466_v31 }
  0xc9   :  { %v292_v46 = vadd.f32 0.0036580483, %v291_v36  ;;  %v303_v47 = vadd.f32 0.014752088, %v302_v37  ;;  %v332_v48 = vadd.f32 0.0036580483, %v331_v38  ;;  %526 = vmatpush.msrb.mxu1 %v482_v32  ;;  %598 = vmatpush.msrb.mxu3 %v482_v32 }
  0xca   :  { %v343_v50 = vadd.f32 0.014752088, %v342_v43  ;;  %v886_v51 = vmin.f32 %v367_v44, 16.0  ;;  %v891_v57 = vmin.f32 %v407_v49, 16.0  ;;  %504 = vmatpush.msrb.mxu0 %v465_v33  ;;  %583 = vmatpush.msrb.mxu2 %v465_v33 }
  0xcb   :  { %v293_v54 = vmul.f32 %v292_v46, %v860_v17  ;;  %v304_v55 = vmul.f32 %v303_v47, %v860_v17  ;;  %v333_v56 = vmul.f32 %v332_v48, %v862_v18  ;;  %527 = vmatpush.msrb.mxu1 %v481_v40  ;;  %v480_v47 = vld [vmem:[#allocation11 + $0x98] sm:$0xff]  ;;  %599 = vmatpush.msrb.mxu3 %v481_v40 }
  0xcc   :  { %v344_v60 = vmul.f32 %v343_v50, %v862_v18  ;;  %v369_v61 = vmul.f32 2.1237322e-06, %v886_v51  ;;  %v380_v62 = vmul.f32 3.8918573e-05, %v886_v51  ;;  %v409_v11 = vmul.f32 2.1237322e-06, %v891_v57  ;;  %505 = vmatpush.msrb.mxu0 %v464_v42  ;;  %584 = vmatpush.msrb.mxu2 %v464_v42 }
  0xcd   :  { %v294_v63 = vadd.f32 0.05243302, %v293_v54  ;;  %v305_v0 = vadd.f32 0.112945676, %v304_v55  ;;  %v334_v1 = vadd.f32 0.05243302, %v333_v56  ;;  %528 = vmatpush.msrb.mxu1 %v480_v47  ;;  %600 = vmatpush.msrb.mxu3 %v480_v47 }
  0xce   :  { %v345_v2 = vadd.f32 0.112945676, %v344_v60  ;;  %v370_v3 = vadd.f32 0.00028619796, %v369_v61  ;;  %v381_v4 = vadd.f32 0.001143296, %v380_v62 }
  0xcf   :  { %v295_v5 = vmul.f32 %v294_v63, %v860_v17  ;;  %v306_v6 = vmul.f32 %v305_v0, %v860_v17  ;;  %v420_v20 = vmul.f32 3.8918573e-05, %v891_v57  ;;  %v335_v24 = vmul.f32 %v334_v1, %v862_v18  ;;  %v463_v50 = vld [vmem:[#allocation11 + $0x10] sm:$0xff]  ;;  %v462_v54 = vld [vmem:[#allocation11 + $0x8] sm:$0xff]  ;;  %529 = vmatpush.msrb.mxu1 %v479_v52  ;;  %v461_v61 = vld [vmem:[#allocation11] sm:$0xff]  ;;  %601 = vmatpush.msrb.mxu3 %v479_v52  ;;  %v166_v52 = vpop.f32.mrf.mxu0 }
  0xd0   :  { %v346_v15 = vmul.f32 %v345_v2, %v862_v18  ;;  %v371_v16 = vmul.f32 %v370_v3, %v886_v51  ;;  %v382_v19 = vmul.f32 %v381_v4, %v886_v51  ;;  %v410_v37 = vadd.f32 0.00028619796, %v409_v11  ;;  %v478_v55 = vld [vmem:[#allocation11 + $0x88] sm:$0xff]  ;;  %506 = vmatpush.msrb.mxu0 %v463_v50  ;;  %585 = vmatpush.msrb.mxu2 %v463_v50  ;;  %v477_v1 = vld [vmem:[#allocation11 + $0x80] sm:$0xff] }
  0xd1   :  { %v307_v22 = vadd.f32 0.4994258, %v306_v6  ;;  %v296_v23 = vadd.f32 0.18741608, %v295_v5  ;;  %v421_v38 = vadd.f32 0.001143296, %v420_v20  ;;  %530 = vmatpush.msrb.mxu1 %v478_v55  ;;  %602 = vmatpush.msrb.mxu3 %v478_v55 }
  0xd2   :  { %v347_v25 = vadd.f32 0.4994258, %v346_v15  ;;  %v383_v27 = vadd.f32 0.014752088, %v382_v19  ;;  %v372_v30 = vadd.f32 0.0036580483, %v371_v16  ;;  %v411_v53 = vmul.f32 %v410_v37, %v891_v57  ;;  %507 = vmatpush.msrb.mxu0 %v462_v54  ;;  %586 = vmatpush.msrb.mxu2 %v462_v54 }
  0xd3   :  { %v308_v29 = vmul.f32 %v307_v22, %v860_v17  ;;  %v336_v43 = vadd.f32 0.18741608, %v335_v24  ;;  %v422_v46 = vmul.f32 %v421_v38, %v891_v57  ;;  %v297_v48 = vmul.f32 %v296_v23, %v860_v17  ;;  %531 = vmatpush.msrb.mxu1 %v477_v1  ;;  %603 = vmatpush.msrb.mxu3 %v477_v1  ;;  %v941_v37 = vld [vmem:[%s978_s3] sm:$0x3] }
  0xd4   :  { %v348_v34 = vmul.f32 %v347_v25, %v862_v18  ;;  %v384_v36 = vmul.f32 %v383_v27, %v886_v51  ;;  %v373_v49 = vmul.f32 %v372_v30, %v886_v51  ;;  %v412_v63 = vadd.f32 0.0036580483, %v411_v53  ;;  %508 = vmatpush.msrb.mxu0 %v461_v61  ;;  %587 = vmatpush.msrb.mxu2 %v461_v61 }
  0xd5   :  { %v907_v41 = vadd.f32 1.0, %v308_v29  ;;  %v337_v17 = vmul.f32 %v336_v43, %v862_v18  ;;  %v423_v58 = vadd.f32 0.014752088, %v422_v46  ;;  %v298_v59 = vadd.f32 1.1283791, %v297_v48 }
  0xd6   :  { %v909_v44 = vadd.f32 1.0, %v348_v34  ;;  %v385_v45 = vadd.f32 0.112945676, %v384_v36  ;;  %v374_v60 = vadd.f32 0.05243302, %v373_v49  ;;  %v413_v19 = vmul.f32 %v412_v63, %v891_v57 }
  0xd7   :  { %615 = vrcp.f32 %v907_v41  ;;  %v424_v0 = vmul.f32 %v423_v58, %v891_v57  ;;  %v338_v4 = vadd.f32 1.1283791, %v337_v17  ;;  %v299_v6 = vmul.f32 %v298_v59, %v851_v9  ;;  %v189_v58 = vpop.f32.mrf.mxu1 }
  0xd8   :  { %617 = vrcp.f32 %v909_v44  ;;  %v386_v56 = vmul.f32 %v385_v45, %v886_v51  ;;  %v375_v12 = vmul.f32 %v374_v60, %v886_v51  ;;  %v319_v15 = vand.u32 2147483647, %v907_v41 }
  0xd9   :  { %v425_v13 = vadd.f32 0.112945676, %v424_v0  ;;  %v321_v20 = vand.u32 2147483648, %v907_v41  ;;  %v359_v22 = vand.u32 2147483647, %v909_v44  ;;  %v361_v24 = vand.u32 2147483648, %v909_v44 }
  0xda   :  { %v387_v62 = vadd.f32 0.4994258, %v386_v56  ;;  %v376_v27 = vadd.f32 0.18741608, %v375_v12  ;;  %vm315_vm2 = vweird.f32 %v907_v41  ;;  %v339_v31 = vmul.f32 %v338_v4, %v854_v10 }
  0xdb   :  { %v426_v9 = vmul.f32 %v425_v13, %v891_v57  ;;  %v414_v32 = vadd.f32 0.05243302, %v413_v19  ;;  %v322_v33 = vor.u32 1.1754944e-38, %v321_v20  ;;  %vm355_vm4 = vweird.f32 %v909_v44 }
  0xdc   :  { %v388_v5 = vmul.f32 %v387_v62, %v886_v51  ;;  %vm320_vm5 = vcmp.eq.f32.partialorder %v319_v15, 8.507059e+37  ;;  %vm360_vm7 = vcmp.eq.f32.partialorder %v359_v22, 8.507059e+37  ;;  %v362_v40 = vor.u32 1.1754944e-38, %v361_v24 }
  0xdd   :  { %v616_v2 = vpop.eup %615  ;;  %v427_v29 = vadd.f32 0.4994258, %v426_v9  ;;  %v377_v42 = vmul.f32 %v376_v27, %v886_v51  ;;  %v415_v47 = vmul.f32 %v414_v32, %v891_v57  ;;  %v145_v48 = vperm.slane %v941_v37, 0  ;;  %v169_v9 = vpop.f32.mrf.mxu0 }
  0xde   :  { %v618_v18 = vpop.eup %617  ;;  %v311_v3 = vmul.f32 %v616_v2, %v907_v41  ;;  %v926_v16 = vadd.f32 1.0, %v388_v5  ;;  %vm316_vm0 = vweird.f32 %v616_v2  ;;  %v279_v53 = vmul.f32 0.5, %v846_v7 }
  0xdf   :  { %v351_v11 = vmul.f32 %v618_v18, %v909_v44  ;;  %vm356_vm1 = vweird.f32 %v618_v18  ;;  %vm317_vm3 = vmor %vm315_vm2, %vm316_vm0  ;;  %v428_v36 = vmul.f32 %v427_v29, %v891_v57  ;;  %v280_v54 = vmul.f32 0.5, %v848_v8 }
  0xe0   :  { %v312_v14 = vsub.f32 1.0, %v311_v3  ;;  %619 = vrcp.f32 %v926_v16  ;;  %vm357_vm6 = vmor %vm355_vm4, %vm356_vm1  ;;  %v146_v51 = vperm.slane %v941_v37, 1  ;;  %v378_v55 = vadd.f32 1.1283791, %v377_v42 }
  0xe1   :  { %v352_v21 = vsub.f32 1.0, %v351_v11  ;;  %v945_v43 = vadd.f32 1.0, %v428_v36  ;;  %v399_v60 = vand.u32 2147483647, %v926_v16  ;;  %v401_v61 = vand.u32 2147483648, %v926_v16 }
  0xe2   :  { %v313_v23 = vmul.f32 %v616_v2, %v312_v14  ;;  %v416_v62 = vadd.f32 0.18741608, %v415_v47  ;;  %v167_v63 = vadd.f32 %v166_v52, %v145_v48  ;;  %v190_v8 = vadd.f32 %v189_v58, %v146_v51 }
  0xe3   :  { %v353_v25 = vmul.f32 %v618_v18, %v352_v21  ;;  %621 = vrcp.f32 %v945_v43  ;;  %vm395_vm9 = vweird.f32 %v926_v16  ;;  %v379_v5 = vmul.f32 %v378_v55, %v873_v35 }
  0xe4   :  { %v314_v30 = vadd.f32 %v616_v2, %v313_v23  ;;  %v417_v11 = vmul.f32 %v416_v62, %v891_v57  ;;  %vm400_vm11 = vcmp.eq.f32.partialorder %v399_v60, 8.507059e+37  ;;  %v441_v22 = vand.u32 2147483648, %v945_v43 }
  0xe5   :  { %v354_v34 = vadd.f32 %v618_v18, %v353_v25  ;;  %v439_v23 = vand.u32 2147483647, %v945_v43  ;;  %v281_v24 = vmul.f32 0.5, %v867_v26  ;;  %vm435_vm13 = vweird.f32 %v945_v43 }
  0xe6   :  { %v318_v38 = vsel %vm317_vm3, %v616_v2, %v314_v30  ;;  %v620_v44 = vpop.eup %619  ;;  %v170_v27 = vadd.f32 %v169_v9, %v145_v48  ;;  %v442_v30 = vor.u32 1.1754944e-38, %v441_v22  ;;  %v282_v26 = vmul.f32 0.5, %v870_v28 }
  0xe7   :  { %v323_v10 = vsel %vm320_vm5, %v322_v33, %v318_v38  ;;  %v358_v41 = vsel %vm357_vm6, %v618_v18, %v354_v34  ;;  %v391_v50 = vmul.f32 %v620_v44, %v926_v16  ;;  %vm396_vm8 = vweird.f32 %v620_v44  ;;  %v192_v38 = vpop.f32.mrf.mxu1 }
  0xe8   :  { %v324_v45 = vmul.f32 %v323_v10, %v299_v6  ;;  %v363_v46 = vsel %vm360_vm7, %v362_v40, %v358_v41  ;;  %vm397_vm10 = vmor %vm395_vm9, %vm396_vm8  ;;  %v402_v6 = vor.u32 1.1754944e-38, %v401_v61  ;;  %v418_v16 = vadd.f32 1.1283791, %v417_v11 }
  0xe9   :  { %v364_v49 = vmul.f32 %v363_v46, %v339_v31  ;;  %v392_v17 = vsub.f32 1.0, %v391_v50  ;;  %v622_v4 = vpop.eup %621  ;;  %vm440_vm15 = vcmp.eq.f32.partialorder %v439_v23, 8.507059e+37  ;;  %v193_v10 = vadd.f32 %v192_v38, %v146_v51 }
  0xea   :  { %v568_v56 = vclamps-f32 %v324_v45, 1.0  ;;  %v431_v13 = vmul.f32 %v622_v4, %v945_v43  ;;  %vm436_vm12 = vweird.f32 %v622_v4  ;;  %v419_v31 = vmul.f32 %v418_v16, %v879_v39  ;;  %v614_v39 = vld [vmem:[%s981_s6] ss:$0 sm:$0xff] }
  0xeb   :  { %v569_v59 = vclamps-f32 %v364_v49, 1.0  ;;  %v393_v0 = vmul.f32 %v620_v44, %v392_v17  ;;  %vm437_vm14 = vmor %vm435_vm13, %vm436_vm12 }
  0xec   :  { %v447_v7 = vadd.f32 1.0, %v568_v56  ;;  %v432_v21 = vsub.f32 1.0, %v431_v13 }
  0xed   :  { %v448_v1 = vadd.f32 1.0, %v569_v59  ;;  %v394_v2 = vadd.f32 %v620_v44, %v393_v0 }
  0xee   :  { %v451_v18 = vmul.f32 %v447_v7, %v279_v53  ;;  %v433_v35 = vmul.f32 %v622_v4, %v432_v21 }
  0xef   :  { %v452_v3 = vmul.f32 %v448_v1, %v280_v54  ;;  %v398_v12 = vsel %vm397_vm10, %v620_v44, %v394_v2 }
  0xf0   :  { %v455_v14 = vmul.f32 %v451_v18, %v167_v63  ;;  %v403_v15 = vsel %vm400_vm11, %v402_v6, %v398_v12  ;;  %v434_v25 = vadd.f32 %v622_v4, %v433_v35 }
  0xf1   :  { %v456_v19 = vmul.f32 %v452_v3, %v190_v8  ;;  %v404_v20 = vmul.f32 %v403_v15, %v379_v5 }
  0xf2   :  { %509 = vmatmul.f32.vlgmr.msrb.gmra.mxu0 %v455_v14  ;;  %v438_v32 = vsel %vm437_vm14, %v622_v4, %v434_v25 }
  0xf3   :  { %532 = vmatmul.f32.vlgmr.msrb.gmra.mxu1 %v456_v19  ;;  %v570_v57 = vclamps-f32 %v404_v20, 1.0  ;;  %v443_v34 = vsel %vm440_vm15, %v442_v30, %v438_v32 }
  0xf4   :  { %v444_v36 = vmul.f32 %v443_v34, %v419_v31 }
  0xf5   :  { %v449_v29 = vadd.f32 1.0, %v570_v57 }
  0xf6   :  { %v571_v40 = vclamps-f32 %v444_v36, 1.0 }
  0xf7   :  { %v453_v33 = vmul.f32 %v449_v29, %v281_v24 }
  0xf8   :  { %v450_v41 = vadd.f32 1.0, %v571_v40 }
  0xf9   :  { %v457_v37 = vmul.f32 %v453_v33, %v170_v27 }
  0xfa   :  { %v454_v42 = vmul.f32 %v450_v41, %v282_v26 }
  0xfb   :  { %512 = vmatmul.f32.vlgmr.msrb.gmra.mxu2 %v457_v37 }
  0xfc   :  { %v458_v43 = vmul.f32 %v454_v42, %v193_v10 }
  0xfe   :  { %535 = vmatmul.f32.vlgmr.msrb.gmra.mxu3 %v458_v43 }
 0x16f   :  { %v510_v44 = vpop.f32.mrf.mxu0 }
 0x170   :  { %v533_v45 = vpop.f32.mrf.mxu1 }
 0x171   :  { %v534_v46 = vadd.f32 %v533_v45, %v510_v44 }
 0x173   :  { %v539_v47 = vadd.f32 %v614_v39, %v534_v46 }
 0x175   :  { %545 = vst [vmem:[#allocation12] sm:$0xff] %v539_v47 }
 0x17e   :  { %v513_v48 = vpop.f32.mrf.mxu2 }
 0x181   :  { %v536_v49 = vpop.f32.mrf.mxu3 }
 0x182   :  { %v537_v28 = vadd.f32 %v536_v49, %v513_v48 }
 0x184   :  { %v540_v50 = vadd.f32 %v614_v39, %v537_v28 }
 0x186   :  { %546 = vst [vmem:[#allocation12 + $0x8] sm:$0xff] %v540_v50 }
 0x187   :  { %559 = dma.vmem_to_hbm [thread:$0]  %s552_s29, 256, %s554_s9, [#allocation5], %s780_s19, %s780_s19, %s781_s20  }
 0x188   :  { %773 = dma.done.wait [#allocation5], 256  }
 0x189   :  { %774 = vsyncadd [#allocation5], 4294967040 }
 0x18a   :  { %564 = vsyncpa [#allocation4], 1 }
 0x18b   :  { %565 = vsyncpa [#allocation7], 1 }
 0x18c   :  { %566 = vsyncpa [#allocation10], 1 }
 0x18d   :  { %567 = vsyncpa [#allocation5], 1 }

</bundles_post_ra>
